<compile_context>
chip_gen: v7x
topology: tpu7x:2x2x1
jax: 0.10.0
libtpu: 0.0.40
codegen_flags: <defaults>
</compile_context>

<pallas_src>
import functools

import jax
import jax.numpy as jnp
from jax.experimental import pallas as pl
from jax.experimental.pallas import tpu as pltpu


def _round_up(n: int, m: int) -> int:
    return ((n + m - 1) // m) * m


def _center_loss_kernel(x_ref, c_ref, csq_ref, labels_ref, part_ref, *, tc):
    # x_ref:      (TB, Dp) compute-dtype VMEM — batch tile of features (zero-padded)
    # c_ref:      (TC, Dp) compute-dtype VMEM — class tile of centers (zero-padded)
    # csq_ref:    (1,  TC) f32 VMEM           — hoisted ||c||^2 for this class tile
    # labels_ref: (TB, 1)  i32 VMEM           — combined label (-1 on padded rows)
    # part_ref:   (1, 8, TC) f32 VMEM         — per-(batch,class)-tile partial sums
    j = pl.program_id(1)                      # class-tile index

    x_in = x_ref[...]                         # (TB, Dp)
    x_f32 = x_in.astype(jnp.float32)
    x_sq = jnp.sum(x_f32 * x_f32, axis=1, keepdims=True)      # (TB, 1) f32

    # Cross term on the MXU, contracting the shared last dim (== x @ c^T).
    cross = jax.lax.dot_general(
        x_in, c_ref[...],
        dimension_numbers=(((1,), (1,)), ((), ())),
        preferred_element_type=jnp.float32)                    # (TB, TC) f32

    # distmat = ||x||^2 + ||c||^2 - 2 x.c   (matches torch's addmm_ form)
    distmat = x_sq + csq_ref[...] - 2.0 * cross                # (TB, TC)

    # Keep only each row's own class (one-hot), fusing torch's clamp.
    classes = j * tc + jax.lax.broadcasted_iota(jnp.int32, distmat.shape, 1)
    on_class = labels_ref[...] == classes      # padded rows/classes never match
    dist = jnp.where(on_class, jnp.clip(distmat, 1e-12, 1e12), 0.0)

    # Cheap partial reduce: TB -> 8 sublanes (tile-aligned reshape, VALU adds).
    tb = dist.shape[0]
    part_ref[0] = jnp.sum(dist.reshape(tb // 8, 8, tc), axis=0)   # (8, TC)


def domain_center_loss(x, centers, domain_labels, class_labels,
                       num_classes_per_domain, *,
                       compute_dtype=jnp.bfloat16, block_b=None):
    """Pallas implementation of DomainCenterLoss.forward.

    x:             (B, feat_dim) float
    centers:       (num_domains, num_classes_per_domain, feat_dim) float
    domain_labels: (B,) int
    class_labels:  (B,) int
    compute_dtype: dtype of the streamed matmul operands (bf16 default;
                   pass jnp.float32 for exact parity with the f32 reference).
    """
    B, D = x.shape
    C = centers.shape[0] * centers.shape[1]                    # num_classes
    assert centers.shape[2] == D

    x_f32 = x.astype(jnp.float32)
    c_f32 = centers.reshape(C, D).astype(jnp.float32)
    labels = (class_labels.astype(jnp.int32)
              + domain_labels.astype(jnp.int32) * num_classes_per_domain)

    itemsize = jnp.dtype(compute_dtype).itemsize
    Dp = _round_up(D, 128)

    # ---- tile sizing: ~4 MiB per x buffer, ~6 MiB per centers tile ----------
    tb_cap = max(8, min(2048, ((4 << 20) // (Dp * itemsize)) // 8 * 8))
    TB = min(_round_up(B, 8), tb_cap)
    if block_b is not None:
        TB = max(8, min(TB, _round_up(block_b, 8)))
    Bp = _round_up(B, TB)
    n_btiles = Bp // TB

    tc_cap = max(128, min(2048, ((6 << 20) // (Dp * itemsize)) // 128 * 128))
    TC = min(_round_up(C, 128), tc_cap)
    Cp = _round_up(C, TC)
    n_ctiles = Cp // TC

    # ---- lane/sublane-dense zero padding ------------------------------------
    # Padded feature columns are zero (distance-neutral); padded classes never
    # match a real label; padded batch rows carry label = -1 (match nothing).
    x_p = x_f32
    if (Bp, Dp) != (B, D):
        x_p = jnp.pad(x_p, ((0, Bp - B), (0, Dp - D)))
    c_p = c_f32
    if (Cp, Dp) != (C, D):
        c_p = jnp.pad(c_p, ((0, Cp - C), (0, Dp - D)))
    csq = jnp.sum(c_p * c_p, axis=1)[None, :]                  # (1, Cp) f32, hoisted
    labels_p = labels
    if Bp != B:
        labels_p = jnp.pad(labels_p, (0, Bp - B), constant_values=-1)
    labels_p = labels_p.reshape(Bp, 1)

    x_p = x_p.astype(compute_dtype)
    c_p = c_p.astype(compute_dtype)

    # ---- VMEM budget / cost hints -------------------------------------------
    buf_bytes = (2 * TB * Dp * itemsize        # x tile, double-buffered
                 + 2 * TC * Dp * itemsize      # centers tile
                 + 2 * 8 * TC * 4              # partial-sum output block
                 + 2 * TC * 4 + 2 * TB * 4)    # csq + labels tiles
    vmem_limit = int(min(64 << 20, max(32 << 20, 2 * buf_bytes)))

    cost = pl.CostEstimate(
        flops=2 * Bp * Cp * Dp + 6 * Bp * Cp,
        transcendentals=0,
        bytes_accessed=(itemsize * (Bp * Dp + n_btiles * Cp * Dp)
                        + 4 * (Cp + Bp + n_btiles * 8 * Cp)),
    )

    kernel = functools.partial(_center_loss_kernel, tc=TC)

    partials = pl.pallas_call(
        kernel,
        out_shape=jax.ShapeDtypeStruct((n_btiles, 8, Cp), jnp.float32),
        grid_spec=pltpu.PrefetchScalarGridSpec(
            num_scalar_prefetch=0,
            grid=(n_btiles, n_ctiles),
            in_specs=[
                pl.BlockSpec((TB, Dp), lambda i, j: (i, 0)),   # x tile
                pl.BlockSpec((TC, Dp), lambda i, j: (j, 0)),   # centers tile
                pl.BlockSpec((1, TC), lambda i, j: (0, j)),    # ||c||^2 tile
                pl.BlockSpec((TB, 1), lambda i, j: (i, 0)),    # labels tile
            ],
            out_specs=pl.BlockSpec((1, 8, TC), lambda i, j: (i, 0, j)),
        ),
        compiler_params=pltpu.CompilerParams(
            dimension_semantics=("parallel", "parallel"),
            vmem_limit_bytes=vmem_limit),
        cost_estimate=cost,
    )(x_p, c_p, csq, labels_p)

    total = jnp.sum(partials)                                  # tree reduce in XLA
    # Torch clamps the masked-out zeros to 1e-12 as well; add the exact
    # closed-form constant (value-identical, summation order differs only by
    # grouping B*(C-1) tiny addends into one — far below f32 tolerance).
    correction = jnp.float32(B * (C - 1)) * jnp.float32(1e-12)
    return (total + correction) / jnp.float32(B)


def _reference_loss(x, centers, domain_labels, class_labels,
                    num_classes_per_domain):
    """Pure-JAX (f32) reference mirroring the PyTorch forward exactly."""
    B, D = x.shape
    c = centers.reshape(-1, D)
    C = c.shape[0]
    distmat = (jnp.sum(x ** 2, axis=1, keepdims=True)
               + jnp.sum(c ** 2, axis=1)[None, :]
               - 2.0 * x @ c.T)
    labels = class_labels + domain_labels * num_classes_per_domain
    mask = (labels[:, None] == jnp.arange(C)[None, :]).astype(jnp.float32)
    dist = jnp.clip(distmat * mask, 1e-12, 1e12)
    return jnp.sum(dist) / B


if __name__ == "__main__":
    # Module hyperparameters (small, consistent with the module's __init__).
    num_domains = 5
    num_classes_per_domain = 5
    feat_dim = 32
    batch = 24

    key = jax.random.PRNGKey(0)
    k_c, k_x, k_d, k_cl = jax.random.split(key, 4)

    # Deterministic "parameter" init (torch.randn equivalent).
    centers = jax.random.normal(
        k_c, (num_domains, num_classes_per_domain, feat_dim), jnp.float32)

    # Example inputs.
    x = jax.random.normal(k_x, (batch, feat_dim), jnp.float32)
    domain_labels = jax.random.randint(k_d, (batch,), 0, num_domains, jnp.int32)
    class_labels = jax.random.randint(
        k_cl, (batch,), 0, num_classes_per_domain, jnp.int32)

    ref = _reference_loss(x, centers, domain_labels, class_labels,
                          num_classes_per_domain)

    # Exact-parity path (f32 operands); block_b=8 forces a multi-tile grid.
    loss_f32 = domain_center_loss(x, centers, domain_labels, class_labels,
                                  num_classes_per_domain,
                                  compute_dtype=jnp.float32, block_b=8)
    loss_f32 = jax.block_until_ready(loss_f32)
    assert jnp.allclose(loss_f32, ref, rtol=1e-5, atol=1e-5), (loss_f32, ref)

    # Default fast path (bf16 streamed operands, f32 accumulation).
    loss_bf16 = domain_center_loss(x, centers, domain_labels, class_labels,
                                   num_classes_per_domain)
    loss_bf16 = jax.block_until_ready(loss_bf16)
    assert jnp.allclose(loss_bf16, ref, rtol=5e-2, atol=1e-1), (loss_bf16, ref)

    # TODO(synk): save_prototypes / save_prototypes_info are file-I/O utilities
    # with no kernel equivalent; intentionally not implemented.
    print("KERNEL_OK")
</pallas_src>

<mosaic_0001>
module attributes {stable_mosaic.version = 11 : i64} {
  func.func @_center_loss_kernel(%arg0: i32, %arg1: i32, %arg2: memref<8x128xf32, #tpu.memory_space<vmem>>, %arg3: memref<128x128xf32, #tpu.memory_space<vmem>>, %arg4: memref<1x128xf32, #tpu.memory_space<vmem>>, %arg5: memref<8x1xi32, #tpu.memory_space<vmem>>, %arg6: memref<1x8x128xf32, #tpu.memory_space<vmem>>) attributes {dimension_semantics = [#tpu.dimension_semantics<parallel>, #tpu.dimension_semantics<parallel>], iteration_bounds = array<i64: 3, 1>, scalar_prefetch = 0 : i64, scratch_operands = 0 : i64, tpu.core_type = #tpu.core_type<tc>, window_params = [{transform_indices = @transform_0, window_bounds = array<i64: 8, 128>}, {transform_indices = @transform_1, window_bounds = array<i64: 128, 128>}, {transform_indices = @transform_2, window_bounds = array<i64: 1, 128>}, {transform_indices = @transform_3, window_bounds = array<i64: 8, 1>}, {transform_indices = @transform_4, window_bounds = array<i64: 1, 8, 128>}]} {
    %c0 = arith.constant 0 : index
    %c0_0 = arith.constant 0 : index
    %0 = vector.load %arg2[%c0, %c0_0] : memref<8x128xf32, #tpu.memory_space<vmem>>, vector<8x128xf32>
    %1 = arith.mulf %0, %0 : vector<8x128xf32>
    %cst = arith.constant dense<0.000000e+00> : vector<8xf32>
    %2 = vector.multi_reduction <add>, %1, %cst [1] : vector<8x128xf32> to vector<8xf32>
    %3 = vector.shape_cast %2 : vector<8xf32> to vector<8x1xf32>
    %c0_1 = arith.constant 0 : index
    %c0_2 = arith.constant 0 : index
    %4 = vector.load %arg3[%c0_1, %c0_2] : memref<128x128xf32, #tpu.memory_space<vmem>>, vector<128x128xf32>
    %cst_3 = arith.constant dense<0.000000e+00> : vector<8x128xf32>
    %5 = tpu.matmul %0, %4, %cst_3 {dimension_numbers = #tpu.dot_dimension_numbers<[1], [1], [0], [0], [0, 0, 1, 0], [], []>} : vector<8x128xf32>, vector<128x128xf32>, vector<8x128xf32> -> vector<8x128xf32>
    %c0_4 = arith.constant 0 : index
    %c0_5 = arith.constant 0 : index
    %6 = vector.load %arg4[%c0_4, %c0_5] : memref<1x128xf32, #tpu.memory_space<vmem>>, vector<1x128xf32>
    %7 = vector.broadcast %3 : vector<8x1xf32> to vector<8x128xf32>
    %8 = vector.broadcast %6 : vector<1x128xf32> to vector<8x128xf32>
    %9 = arith.addf %7, %8 : vector<8x128xf32>
    %cst_6 = arith.constant 2.000000e+00 : f32
    %10 = vector.broadcast %cst_6 : f32 to vector<8x128xf32>
    %11 = arith.mulf %10, %5 : vector<8x128xf32>
    %12 = arith.subf %9, %11 : vector<8x128xf32>
    %c128_i32 = arith.constant 128 : i32
    %13 = arith.muli %arg1, %c128_i32 : i32
    %14 = tpu.iota {dimensions = array<i32: 1>} : vector<8x128xi32>
    %15 = vector.broadcast %13 : i32 to vector<8x128xi32>
    %16 = arith.addi %15, %14 : vector<8x128xi32>
    %c0_7 = arith.constant 0 : index
    %c0_8 = arith.constant 0 : index
    %17 = vector.load %arg5[%c0_7, %c0_8] : memref<8x1xi32, #tpu.memory_space<vmem>>, vector<8x1xi32>
    %18 = vector.broadcast %17 : vector<8x1xi32> to vector<8x128xi32>
    %19 = arith.cmpi eq, %18, %16 : vector<8x128xi32>
    %cst_9 = arith.constant 9.99999996E-13 : f32
    %cst_10 = arith.constant 9.99999995E+11 : f32
    %20 = vector.broadcast %cst_9 : f32 to vector<8x128xf32>
    %21 = arith.maximumf %20, %12 : vector<8x128xf32>
    %22 = vector.broadcast %cst_10 : f32 to vector<8x128xf32>
    %23 = arith.minimumf %22, %21 : vector<8x128xf32>
    %cst_11 = arith.constant 0.000000e+00 : f32
    %24 = vector.broadcast %cst_11 : f32 to vector<8x128xf32>
    %25 = arith.select %19, %23, %24 : vector<8x128xi1>, vector<8x128xf32>
    %26 = vector.shape_cast %25 : vector<8x128xf32> to vector<1x8x128xf32>
    %cst_12 = arith.constant dense<0.000000e+00> : vector<8x128xf32>
    %27 = vector.multi_reduction <add>, %26, %cst_12 [0] : vector<1x8x128xf32> to vector<8x128xf32>
    %c0_13 = arith.constant 0 : index
    %c0_14 = arith.constant 0 : index
    %c0_15 = arith.constant 0 : index
    %28 = vector.load %arg6[%c0_13, %c0_14, %c0_15] : memref<1x8x128xf32, #tpu.memory_space<vmem>>, vector<1x8x128xf32>
    %29 = vector.shape_cast %28 : vector<1x8x128xf32> to vector<8x128xf32>
    %30 = vector.shape_cast %27 : vector<8x128xf32> to vector<1x8x128xf32>
    tpu.vector_store %arg6[%c0_13, %c0_14, %c0_15], %30 {strides = array<i32>} : memref<1x8x128xf32, #tpu.memory_space<vmem>>, vector<1x8x128xf32>,
    return
  }
  func.func @transform_0(%arg0: i32, %arg1: i32) -> (i32, i32) {
    %c0_i32 = arith.constant 0 : i32
    %c0_i32_0 = arith.constant 0 : i32
    return %arg0, %c0_i32 : i32, i32
  }
  func.func @transform_1(%arg0: i32, %arg1: i32) -> (i32, i32) {
    %c0_i32 = arith.constant 0 : i32
    %c0_i32_0 = arith.constant 0 : i32
    return %arg1, %c0_i32 : i32, i32
  }
  func.func @transform_2(%arg0: i32, %arg1: i32) -> (i32, i32) {
    %c0_i32 = arith.constant 0 : i32
    %c0_i32_0 = arith.constant 0 : i32
    return %c0_i32, %arg1 : i32, i32
  }
  func.func @transform_3(%arg0: i32, %arg1: i32) -> (i32, i32) {
    %c0_i32 = arith.constant 0 : i32
    %c0_i32_0 = arith.constant 0 : i32
    return %arg0, %c0_i32 : i32, i32
  }
  func.func @transform_4(%arg0: i32, %arg1: i32) -> (i32, i32, i32) {
    %c0_i32 = arith.constant 0 : i32
    %c0_i32_0 = arith.constant 0 : i32
    return %arg0, %c0_i32, %arg1 : i32, i32, i32
  }
}

</mosaic_0001>

<bundles_post_ra>
// kernel: tpu_custom_call.1
= control target key start
LH: loop header
LB: loop body
LE: loop exit
PB: predicated region body
PF: predicated region fallthrough
CT: control target
= control target key end

     0   :  { %9 = vsyncpa [#allocation3], 0  ;;  %s964_s0 = inlined_call_operand.vmem [shape: f32[24,128], index: 0, kind: input, shape index: {}]   ;;  %s965_s1 = inlined_call_operand.hbm [shape: f32[128,128], index: 1, kind: input, shape index: {}]   ;;  %s966_s2 = inlined_call_operand.vmem [shape: f32[1,128], index: 2, kind: input, shape index: {}]   ;;  %s967_s3 = inlined_call_operand.vmem [shape: s32[24,1], index: 3, kind: input, shape index: {}]   ;;  %s968_s4 = inlined_call_operand.hbm [shape: f32[3,8,128], index: 4, kind: output, shape index: {}]  }
   0x1   :  { %10 = vsyncpa [#allocation4], 0 }
   0x2   :  { %12 = vsyncpa [#allocation4 + $0x1], 0  ;;  %s808_s15 = smov 0   ;;  %s810_s16 = smov 0  }
   0x3   :  { %s812_s17 = smov 0   ;;  %s814_s18 = smov 0  }
   0x4   :  { %s816_s19 = smov 0   ;;  %s818_s20 = smov 0  }
   0x5 LB: > { %s498_s21 = sadd.s32 4294967295, %s773_s20   ;;  %s499_s22 = sadd.s32 4294967294, %s773_s20   ;;  %s773_s20 = sphi %s818_s20, %s18_s20   ;;  %s769_s19 = sphi %s816_s19, %s986_s19   ;;  %s765_s18 = sphi %s814_s18, %s985_s18   ;;  %s761_s17 = sphi %s812_s17, %s984_s17   ;;  %s757_s16 = sphi %s810_s16, %s983_s16   ;;  %s753_s15 = sphi %s808_s15, %s982_s15  }
   0x6   : > { %s30_s23 = sadd.s32 1, %s769_s19  ;;  %s143_s24 = sadd.s32 1, %s761_s17 }
   0x7   : > { %p32_p0 = scmp.ge.s32.totalorder %s30_s23, 3  ;;  %p153_p1 = scmp.ne.s32.totalorder %s761_s17, %s757_s16 }
   0x8   : > { %p154_p2 = scmp.eq.s32.totalorder %s498_s21, 2  ;;  %p159_p3 = scmp.ne.s32.totalorder %s757_s16, %s753_s15 }
   0x9   : > { %s988_s23 = smov (%p32_p0, %s30_s23), 0  ;;  %p160_p5 = scmp.eq.s32.totalorder %s499_s22, 2 }
   0xa   : > { %p848_p4 = por %p154_p2, %p153_p1  ;;  %s138_s26 = ssub.s32 %s769_s19, %s988_s23 }
   0xb   : > { %p500_p6 = scmp.ge.s32.totalorder %s773_s20, 1  ;;  %p141_p7 = scmp.eq.s32.totalorder %s138_s26, 0 }
   0xc   : > { %s973_s25 = scalar_select %p848_p4, 1, 0 }
   0xd   : > { %p855_p8 = por %p160_p5, %p159_p3  ;;  %p167_p9 = scmp.lt.s32.totalorder %s773_s20, 4 }
   0xe   : > { %s861_s28 = scalar_select %p141_p7, %s761_s17, %s143_s24  }
   0xf   : > { %s974_s27 = scalar_select %p855_p8, 1, 0 }
  0x10   : > { %p863_p10 = pnand %p500_p6, %p167_p9  ;;  %p867_p11 = scmp.eq.s32.totalorder %s498_s21, 0 }
  0x11   : > { %s775_s5 = smov [#allocation2]   ;;  %s663_s10 = scalar_lea.hbm %s965_s1, 2048 }
  0x12   : > { %s975_s29 = scalar_select %p863_p10, 1, 0 }
  0x13   : > { %s976_s30 = scalar_select %p867_p11, 1, 0 }
  0x14   : > { %p596_p12 = pneg %p863_p10  ;;  %s182_s6 = sshll.u32 %s775_s5, 4  ;;  %s183_s6 = int_to_ptr.vmem [resolvable:$true] %s182_s6 }
  0x15   : > { %p664_p0 = scmp.ne.s32.totalorder %s965_s1, %s663_s10  ;;  %p670_p5 = scmp.lt.u32.totalorder %s663_s10, %s965_s1 }
  0x16   : > { %p875_p13 = pnand %p867_p11, %p596_p12 }
  0x18   : > { %p665_p1 = pneg %p875_p13 }
  0x1a   : > { %p666_p2 = pnand %p665_p1, %p664_p0 }
  0x1c   : > { %p667_p3 = pneg %p666_p2 }
  0x1e   : > { %p672_p6 = pnand %p670_p5, %p667_p3 }
  0x20   : > { %675 = shalt.err (!%p672_p6)
}
  0x21   : > { %s676_s21 = scalar_lea.vmem %s183_s6, 2048  ;;  %p684_p8 = scmp.lt.s32.totalorder %s183_s6, %s183_s6 }
  0x22   : > { %p677_p7 = scmp.ne.s32.totalorder %s183_s6, %s676_s21  ;;  %p685_p4 = scmp.lt.s32.totalorder %s676_s21, %s676_s21 }
  0x24   : > { %p679_p9 = pnand %p677_p7, %p665_p1  ;;  %p686_p11 = por %p685_p4, %p684_p8 }
  0x26   : > { %p680_p12 = pneg %p679_p9 }
  0x28   : > { %p687_p10 = pnand %p686_p11, %p680_p12 }
  0x2a   : > { %690 = shalt.err (!%p687_p10)
}
  0x2b   : > { %s776_s22 = smov 128   ;;  %s777_s24 = smov 8  }
  0x2c   : > { %599 = dma.hbm_to_vmem [thread:$0]  (!%p875_p13), %s965_s1, 2048, %s183_s6, [#allocation3], %s776_s22, %s776_s22, %s777_s24  }
  0x2d   : > { %p978_p0 = scmp.ne.s32.totalorder %s975_s29, 0 }
  0x2e   : > { %p979_p2 = scmp.ne.s32.totalorder (!%p978_p0), %s976_s30, 0 }
  0x2f   : > { %218 = sbr.rel (%p978_p0) target bundleno = 357 (0x165), region = 36 }
  0x36   : > { %744 = dma.done.wait (%p979_p2), [#allocation3], 2048  }
  0x37   : > { %746 = vsyncadd (%p979_p2), [#allocation3], 4294965248  ;;  %p250_p4 = scmp.lt.s32.totalorder %s765_s18, 2  ;;  %v778_v0 = vmov 0.0|0.0   ;;  %vm779_vm0 = vmmov 0   ;;  %v780_v1 = vmov 0.0   ;;  %v363_v32 = vlaneseq }
  0x38   : > { %566 = vmatprep.subr.bf16.mxu0 %v778_v0  ;;  %563 = vmatprep.mubr.msk.f32.mxu0 %vm779_vm0, %v780_v1  ;;  %v781_v2 = vmov 0   ;;  %v266_v3 = vld [vmem:[#allocation2] sm:$0xff]  ;;  %v267_v4 = vld [vmem:[#allocation2 + $0x8] sm:$0xff]  ;;  %v268_v6 = vld [vmem:[#allocation2 + $0x10] sm:$0xff]  ;;  %s247_s14 = sand.u32 1, %s757_s16   ;;  %s511_s22 = sshll.u32 %s765_s18, 7 }
  0x39   : > { %s251_s7 = scalar_select %p250_p4, %s765_s18, 2  ;;  %662 = vset.pattern.permute.xlu0 %v781_v2  ;;  %v567_v5 = vpack.c.bf16 %v267_v4, %v266_v3  ;;  %v269_v7 = vld [vmem:[#allocation2 + $0x18] sm:$0xff]  ;;  %v270_v11 = vld [vmem:[#allocation2 + $0x20] sm:$0xff]  ;;  %v271_v12 = vld [vmem:[#allocation2 + $0x28] sm:$0xff]  ;;  %v364_v37 = vand.u32 127, %v363_v32 }
  0x3a   : > { %v570_v10 = vpack.c.bf16 %v269_v7, %v268_v6  ;;  %v573_v13 = vpack.c.bf16 %v271_v12, %v270_v11  ;;  %v272_v14 = vld [vmem:[#allocation2 + $0x30] sm:$0xff]  ;;  %v273_v15 = vld [vmem:[#allocation2 + $0x38] sm:$0xff]  ;;  %v274_v18 = vld [vmem:[#allocation2 + $0x40] sm:$0xff]  ;;  %s506_s21 = sshll.u32 %s247_s14, 3  ;;  %s378_s29 = scalar_lea.sflag [#allocation4], %s247_s14 }
  0x3b   : > { %s507_s6 = sshll.u32 %s251_s7, 3  ;;  %568 = vmatpush3.bf16.xpose.msra.mxu0 %v567_v5  ;;  %v576_v16 = vpack.c.bf16 %v273_v15, %v272_v14  ;;  %v275_v19 = vld [vmem:[#allocation2 + $0x48] sm:$0xff]  ;;  %v276_v21 = vld [vmem:[#allocation2 + $0x50] sm:$0xff]  ;;  %v277_v22 = vld [vmem:[#allocation2 + $0x58] sm:$0xff]  ;;  %s249_s24 = scalar_lea.vmem [#allocation5], %s506_s21 }
  0x3c   : > { %s253_s30 = scalar_lea.vmem %s964_s0, %s507_s6  ;;  %569 = vmatprep.subr.bf16.mxu0 %v778_v0  ;;  %s261_s11 = scalar_lea.vmem %s967_s3, %s507_s6  ;;  %v579_v20 = vpack.c.bf16 %v275_v19, %v274_v18  ;;  %v582_v23 = vpack.c.bf16 %v277_v22, %v276_v21  ;;  %v278_v24 = vld [vmem:[#allocation2 + $0x60] sm:$0xff]  ;;  %v279_v25 = vld [vmem:[#allocation2 + $0x68] sm:$0xff]  ;;  %v280_v27 = vld [vmem:[#allocation2 + $0x70] sm:$0xff] }
  0x3d   : > { %v262_v8 = vld [vmem:[%s253_s30] sm:$0xff]  ;;  %v585_v26 = vpack.c.bf16 %v279_v25, %v278_v24  ;;  %v281_v28 = vld [vmem:[#allocation2 + $0x78] sm:$0xff]  ;;  %s392_s26 = sshll.u32 %s249_s24, 4  ;;  %s917_s6 = scalar_lea.hbm %s968_s4, %s511_s22  ;;  %s919_s26 = int_to_ptr.vmem [resolvable:$true] %s392_s26 }
  0x3e   : > { %v263_v9 = vmul.f32 %v262_v8, %v262_v8  ;;  %v367_v17 = vld [vmem:[%s261_s11] sm:$0xff]  ;;  %v588_v29 = vpack.c.bf16 %v281_v28, %v280_v27  ;;  %s691_s8 = scalar_lea.vmem %s919_s26, 128  ;;  %p980_p10 = scmp.ne.s32.totalorder %s973_s25, 0 }
  0x3f   : > { %v509_v30 = vld [vmem:[%s966_s2] ss:$0 sm:$0xff]  ;;  %p692_p8 = scmp.ne.s32.totalorder %s919_s26, %s691_s8  ;;  %s782_s18 = smov [#allocation5]  }
  0x40   : > { %264 = vadd.xlane.f32.xlu0 %v263_v9  ;;  %s695_s30 = sshll.u32 %s782_s18, 4  ;;  %s696_s30 = int_to_ptr.vmem [resolvable:$false] %s695_s30 }
  0x41   : > { %p693_p11 = pnand %p692_p8, %p980_p10  ;;  %s697_s9 = scalar_lea.vmem %s696_s30, 256 }
  0x42   : > { %p698_p1 = scmp.lt.s32.totalorder %s919_s26, %s696_s30  ;;  %p699_p3 = scmp.lt.s32.totalorder %s697_s9, %s691_s8 }
  0x43   : > { %571 = vmatpush3.bf16.xpose.msra.mxu0 %v570_v10  ;;  %p694_p13 = pneg %p693_p11 }
  0x44   : > { %572 = vmatprep.subr.bf16.mxu0 %v778_v0  ;;  %p700_p5 = por %p699_p3, %p698_p1 }
  0x46   : > { %p701_p6 = pnand %p700_p5, %p694_p13 }
  0x4b   : > { %574 = vmatpush3.bf16.xpose.msra.mxu0 %v573_v13 }
  0x4c   : > { %575 = vmatprep.subr.bf16.mxu0 %v778_v0 }
  0x53   : > { %577 = vmatpush3.bf16.xpose.msra.mxu0 %v576_v16 }
  0x54   : > { %578 = vmatprep.subr.bf16.mxu0 %v778_v0 }
  0x56   : > { %369 = vperm.xlu0 %662, %v367_v17  }
  0x5b   : > { %580 = vmatpush3.bf16.xpose.msra.mxu0 %v579_v20 }
  0x5c   : > { %581 = vmatprep.subr.bf16.mxu0 %v778_v0 }
  0x63   : > { %583 = vmatpush3.bf16.xpose.msra.mxu0 %v582_v23 }
  0x64   : > { %584 = vmatprep.subr.bf16.mxu0 %v778_v0 }
  0x6b   : > { %586 = vmatpush3.bf16.xpose.msra.mxu0 %v585_v26 }
  0x6c   : > { %587 = vmatprep.subr.bf16.mxu0 %v778_v0 }
  0x73   : > { %589 = vmatpush3.bf16.xpose.msra.mxu0 %v588_v29 }
  0x7a   : > { %564 = vmatmul.mubr.f32.vlgmr.msra.gmra.mrb[0].mxu0 %v262_v8 }
  0xcd   : > { %v265_v31 = vpop.xlane.xlu0 %264 }
  0xce   : > { %v359_v33 = vadd.f32 %v509_v30, %v265_v31 }
  0xd5   : > { %v370_v39 = vpop.permute.xlu0 %369 }
  0xd6   : > { %vm371_vm1 = vcmp.eq.s32.totalorder %v370_v39, %v364_v37 }
 0x14d   : > { %v348_v34 = vpop.f32.mrb[0].mxu0 }
 0x14e   : > { %v360_v35 = vmul.f32 2.0, %v348_v34  ;;  %v565_v36 = vpop.f32.mrb[1].mxu0 }
 0x150   : > { %v361_v38 = vsub.f32 %v359_v33, %v360_v35 }
 0x152   : > { %v372_v40 = vmax.f32 %v361_v38, 1e-12 }
 0x154   : > { %v373_v41 = vmin.f32 %v372_v40, 1e+12 }
 0x156   : > { %v374_v42 = vsel %vm371_vm1, %v373_v41, 0.0 }
 0x157   : > { %376 = vst [vmem:[%s249_s24] sm:$0xff] %v374_v42 }
 0x158   : > { %704 = shalt.err (!%p701_p6)
}
 0x159   : > { %s705_s10 = scalar_lea.hbm %s917_s6, 128  ;;  %s709_s13 = scalar_lea.hbm %s968_s4, 384 }
 0x15a   : > { %p706_p7 = scmp.ne.s32.totalorder %s917_s6, %s705_s10  ;;  %p710_p0 = scmp.lt.u32.totalorder %s917_s6, %s968_s4 }
 0x15b   : > { %p711_p2 = scmp.lt.u32.totalorder %s709_s13, %s705_s10  ;;  %p713_p8 = scmp.lt.u32.totalorder %s705_s10, %s917_s6 }
 0x15c   : > { %p707_p9 = pnand %p706_p7, %p980_p10 }
 0x15d   : > { %p712_p4 = por %p711_p2, %p710_p0 }
 0x15e   : > { %p708_p12 = pneg %p707_p9 }
 0x15f   : > { %p714_p11 = por %p713_p8, %p712_p4 }
 0x161   : > { %p715_p13 = pnand %p714_p11, %p708_p12 }
 0x163   : > { %718 = shalt.err (!%p715_p13)
}
 0x164   : > { %594 = dma.vmem_to_hbm [thread:$0]  (%p980_p10), %s919_s26, 128, %s917_s6, %s378_s29  }
 0x165 PF: > { %p606_p1 = scmp.ge.s32.totalorder %s773_s20, 2  ;;  %s404_s22 = sand.u32 1, %s753_s15  }
 0x166   : > { %p981_p3 = scmp.ne.s32.totalorder %s974_s27, 0  ;;  %s405_s24 = scalar_lea.sflag [#allocation4], %s404_s22 }
 0x168   : > { %p601_p5 = pnand %p606_p1, %p981_p3 }
 0x16a   : > { %748 = dma.done.wait (!%p601_p5), %s405_s24, 128  }
 0x16b   : > { %750 = vsyncadd (!%p601_p5), %s405_s24, 4294967168  ;;  %s18_s20 = sadd.s32 1, %s773_s20   ;;  %s982_s15 = smov %s757_s16 }
 0x16c   : > { %p15_p6 = scmp.ge.s32.totalorder %s18_s20, 5   ;;  %s983_s16 = smov %s761_s17 }
 0x16d   : > { %s984_s17 = smov %s861_s28  ;;  %s985_s18 = smov %s769_s19 }
 0x16e   : > { %s986_s19 = smov %s988_s23  ;;  %17 = sbr.rel (!%p15_p6) target bundleno = 5 (0x5), region = 83 }
 0x175   :  { %410 = vsyncpa [#allocation3], 1 }
 0x176   :  { %412 = vsyncpa [#allocation3 + $0x1], 1 }
 0x177   :  { %413 = vsyncpa [#allocation4], 1 }
 0x178   :  { %415 = vsyncpa [#allocation4 + $0x1], 1 }

</bundles_post_ra>
